<compile_context>
chip_gen: v6e
topology: v6e:2x2x1
jax: 0.10.0
libtpu: 0.0.40
codegen_flags: <defaults>
</compile_context>

<pallas_src>
import functools

import jax
import jax.numpy as jnp
from jax.experimental import pallas as pl
from jax.experimental.pallas import tpu as pltpu

_BN_EPS = 1e-5
_LANE = 128
_SINGLE_K_MAX = 8192          # 3x3 weights up to (8192, Cp) bf16 stay VMEM-resident


def _round_up(x, m):
    return (x + m - 1) // m * m


def _cdiv(a, b):
    return -(-a // b)


def _chip_vmem_bytes():
    try:
        return int(pltpu.get_tpu_info().vmem_capacity_bytes)
    except Exception:                       # CPU / interpret mode / older API
        return 64 * 1024 * 1024


_VMEM_CAP = _chip_vmem_bytes()
_VMEM_LIMIT = min((_VMEM_CAP * 3) // 4, 96 * 1024 * 1024)   # 48 MiB on v7x, 96 MiB v5e/v6e
_M_TILE_TARGET = 1024 if _VMEM_CAP >= 100 * 1024 * 1024 else 512


def _compiler_params(sem):
    return pltpu.CompilerParams(dimension_semantics=sem,
                                vmem_limit_bytes=_VMEM_LIMIT)


def _pad2(a, rows, cols):
    return jnp.pad(a, ((0, rows - a.shape[0]), (0, cols - a.shape[1])))


def _tiles_m(m, target=_M_TILE_TARGET):
    """M-tile (multiple of 16), padded M, #tiles.  Guarantees >=2 tiles when possible."""
    m16 = _round_up(m, 16)
    tm = min(target, m16)
    if m16 // tm < 2 and tm > 16:           # keep both v7x TensorCores busy
        tm = max(16, _round_up(m16 // 2, 16))
    mp = _round_up(m, tm)
    return tm, mp, mp // tm


def _k_tiling(k):
    """(kp, tk, nk): minimal 128-aligned K padding; single block when it fits."""
    kp0 = _round_up(k, _LANE)
    if kp0 <= _SINGLE_K_MAX:
        return kp0, kp0, 1
    nk = _cdiv(kp0, 2048)
    tk = _round_up(_cdiv(kp0, nk), _LANE)
    return tk * nk, tk, nk


# ------------------------------ Pallas kernels -------------------------------

def _conv_stats_kernel_1blk(p_ref, w_ref, y_ref, stats_ref):
    """conv-as-matmul (single K block, weights resident) + partial BN sums."""
    acc = jnp.dot(p_ref[...], w_ref[...], preferred_element_type=jnp.float32)
    y_ref[...] = acc.astype(y_ref.dtype)
    s = jnp.sum(acc, axis=0, keepdims=True)            # (1, Cp)
    sq = jnp.sum(acc * acc, axis=0, keepdims=True)      # (1, Cp)
    stats_ref[...] = jnp.concatenate([s, sq], axis=0).reshape(1, 2, s.shape[-1])


def _conv_stats_kernel_multik(p_ref, w_ref, y_ref, stats_ref, acc_ref):
    """Fallback for very large K: grid=(M tiles, K tiles), f32 accumulator."""
    k = pl.program_id(1)                     # top level only (interpret-mode safe)
    nk = pl.num_programs(1)

    @pl.when(k == 0)
    def _init():
        acc_ref[...] = jnp.zeros_like(acc_ref)

    acc_ref[...] += jnp.dot(p_ref[...], w_ref[...],
                            preferred_element_type=jnp.float32)

    @pl.when(k == nk - 1)
    def _finalize():
        acc = acc_ref[...]
        y_ref[...] = acc.astype(y_ref.dtype)
        s = jnp.sum(acc, axis=0, keepdims=True)
        sq = jnp.sum(acc * acc, axis=0, keepdims=True)
        stats_ref[...] = jnp.concatenate([s, sq], axis=0).reshape(
            1, 2, s.shape[-1])


def _bn_add_relu_kernel(y_ref, r_ref, scale_ref, shift_ref, o_ref):
    """Stage-2 epilogue with identity shortcut: relu(y*scale + shift + res)."""
    y = (y_ref[...].astype(jnp.float32) * scale_ref[...] + shift_ref[...]
         + r_ref[...].astype(jnp.float32))
    o_ref[...] = jnp.maximum(y, 0.0).astype(o_ref.dtype)


def _bn_proj_add_relu_kernel(y_ref, xs_ref, w3_ref, b3_ref,
                             scale_ref, shift_ref, o_ref):
    """Stage-2 epilogue with the 1x1-conv projection shortcut fused in."""
    res = jnp.dot(xs_ref[...], w3_ref[...],
                  preferred_element_type=jnp.float32) + b3_ref[...]
    y = y_ref[...].astype(jnp.float32) * scale_ref[...] + shift_ref[...] + res
    o_ref[...] = jnp.maximum(y, 0.0).astype(o_ref.dtype)


# ------------------------------ pallas_call wrappers -------------------------

def _conv_stats_call(patches, weights, *, tm, tk):
    mp, kp = patches.shape
    cp = weights.shape[1]
    nm, nk = mp // tm, kp // tk
    out_shape = (jax.ShapeDtypeStruct((mp, cp), jnp.bfloat16),
                 jax.ShapeDtypeStruct((nm, 2, cp), jnp.float32))

    if nk == 1:
        # Weights index_map is constant -> the (kp, cp) block is DMA'd once and
        # stays VMEM-resident across all M tiles; no accumulator scratch needed.
        return pl.pallas_call(
            _conv_stats_kernel_1blk,
            out_shape=out_shape,
            grid_spec=pltpu.PrefetchScalarGridSpec(
                num_scalar_prefetch=0, grid=(nm,),
                in_specs=[pl.BlockSpec((tm, kp), lambda i: (i, 0)),
                          pl.BlockSpec((kp, cp), lambda i: (0, 0))],
                out_specs=[pl.BlockSpec((tm, cp), lambda i: (i, 0)),
                           pl.BlockSpec((1, 2, cp), lambda i: (i, 0, 0))]),
            compiler_params=_compiler_params(("parallel",)),
        )(patches, weights)

    return pl.pallas_call(
        _conv_stats_kernel_multik,
        out_shape=out_shape,
        grid_spec=pltpu.PrefetchScalarGridSpec(
            num_scalar_prefetch=0, grid=(nm, nk),
            in_specs=[pl.BlockSpec((tm, tk), lambda i, k: (i, k)),
                      pl.BlockSpec((tk, cp), lambda i, k: (k, 0))],
            out_specs=[pl.BlockSpec((tm, cp), lambda i, k: (i, 0)),
                       pl.BlockSpec((1, 2, cp), lambda i, k: (i, 0, 0))],
            scratch_shapes=[pltpu.VMEM((tm, cp), jnp.float32)]),
        compiler_params=_compiler_params(("parallel", "arbitrary")),
    )(patches, weights)


def _bn_add_relu_call(y, res, scale, shift, *, tm, out_dtype=jnp.float32):
    mp, cp = y.shape
    nm = mp // tm
    return pl.pallas_call(
        _bn_add_relu_kernel,
        out_shape=jax.ShapeDtypeStruct((mp, cp), out_dtype),
        grid_spec=pltpu.PrefetchScalarGridSpec(
            num_scalar_prefetch=0, grid=(nm,),
            in_specs=[pl.BlockSpec((tm, cp), lambda i: (i, 0)),
                      pl.BlockSpec((tm, cp), lambda i: (i, 0)),
                      pl.BlockSpec((1, cp), lambda i: (0, 0)),
                      pl.BlockSpec((1, cp), lambda i: (0, 0))],
            out_specs=pl.BlockSpec((tm, cp), lambda i: (i, 0))),
        compiler_params=_compiler_params(("parallel",)),
    )(y, res, scale, shift)


def _bn_proj_add_relu_call(y, xs, w3, b3, scale, shift, *, tm,
                           out_dtype=jnp.float32):
    mp, cp = y.shape
    cinp = xs.shape[1]
    nm = mp // tm
    return pl.pallas_call(
        _bn_proj_add_relu_kernel,
        out_shape=jax.ShapeDtypeStruct((mp, cp), out_dtype),
        grid_spec=pltpu.PrefetchScalarGridSpec(
            num_scalar_prefetch=0, grid=(nm,),
            in_specs=[pl.BlockSpec((tm, cp), lambda i: (i, 0)),
                      pl.BlockSpec((tm, cinp), lambda i: (i, 0)),
                      pl.BlockSpec((cinp, cp), lambda i: (0, 0)),
                      pl.BlockSpec((1, cp), lambda i: (0, 0)),
                      pl.BlockSpec((1, cp), lambda i: (0, 0)),
                      pl.BlockSpec((1, cp), lambda i: (0, 0))],
            out_specs=pl.BlockSpec((tm, cp), lambda i: (i, 0))),
        compiler_params=_compiler_params(("parallel",)),
    )(y, xs, w3, b3, scale, shift)


# --------------------------------- JAX glue ----------------------------------

def _im2col_3x3(x_nhwc, stride, *, kp, mp):
    """pad=1 3x3 im2col -> (mp, kp) bf16; K zero-pad folded into the concat."""
    n, h, w, c = x_nhwc.shape
    xp = jnp.pad(x_nhwc, ((0, 0), (1, 1), (1, 1), (0, 0)))
    ho = (h - 1) // stride + 1
    wo = (w - 1) // stride + 1
    m = n * ho * wo
    cols = []
    for kh in range(3):
        for kw in range(3):
            tap = jax.lax.slice(
                xp, (0, kh, kw, 0),
                (n, kh + (ho - 1) * stride + 1, kw + (wo - 1) * stride + 1, c),
                (1, stride, stride, 1))
            cols.append(tap.reshape(m, c))
    if kp > 9 * c:
        cols.append(jnp.zeros((m, kp - 9 * c), x_nhwc.dtype))
    p = jnp.concatenate(cols, axis=1)
    if mp > m:
        p = jnp.pad(p, ((0, mp - m), (0, 0)))   # padded rows are exact zeros
    return p, (ho, wo)


def _bn_scale_shift(stats, gamma, beta, m_valid, cp):
    """Reduce per-tile partial sums -> per-channel BN scale/shift (f32)."""
    s = jnp.sum(stats, axis=0)                              # (2, Cp)
    mean = s[0] / m_valid
    var = jnp.maximum(s[1] / m_valid - mean * mean, 0.0)    # biased variance
    inv_std = jax.lax.rsqrt(var + _BN_EPS)
    g = jnp.pad(gamma, (0, cp - gamma.shape[0]))
    b = jnp.pad(beta, (0, cp - beta.shape[0]))
    scale = g * inv_std
    shift = b - mean * scale
    return scale.reshape(1, cp), shift.reshape(1, cp)


def init_residual_params(key, input_channels, num_channels, use_1x1conv):
    ks = jax.random.split(key, 6)

    def conv_w(k, cin, cout, kh, kw):                       # HWIO layout
        bound = 1.0 / jnp.sqrt(float(cin * kh * kw))
        return jax.random.uniform(k, (kh, kw, cin, cout), jnp.float32,
                                  -bound, bound)

    params = {
        "w1": conv_w(ks[0], input_channels, num_channels, 3, 3),
        "b1": jax.random.uniform(ks[1], (num_channels,), jnp.float32, -0.1, 0.1),
        "w2": conv_w(ks[2], num_channels, num_channels, 3, 3),
        "b2": jax.random.uniform(ks[3], (num_channels,), jnp.float32, -0.1, 0.1),
        "bn1_gamma": jnp.ones((num_channels,), jnp.float32),
        "bn1_beta": jnp.zeros((num_channels,), jnp.float32),
        "bn2_gamma": jnp.ones((num_channels,), jnp.float32),
        "bn2_beta": jnp.zeros((num_channels,), jnp.float32),
    }
    if use_1x1conv:
        params["w3"] = conv_w(ks[4], input_channels, num_channels, 1, 1)
        params["b3"] = jax.random.uniform(ks[5], (num_channels,), jnp.float32,
                                          -0.1, 0.1)
    return params


def residual_forward(x_nchw, params, *, strides=1, use_1x1conv=False):
    # NCHW <-> NHWC transposes kept only at the block boundaries (module keeps
    # the PyTorch NCHW interface); stacked blocks should stay NHWC end-to-end.
    x = jnp.transpose(x_nchw, (0, 2, 3, 1)).astype(jnp.float32)
    n, h, w, cin = x.shape
    cout = params["w1"].shape[-1]
    cp = _round_up(cout, _LANE)
    x_bf = x.astype(jnp.bfloat16)

    ho = (h - 1) // strides + 1
    wo = (w - 1) // strides + 1
    m = n * ho * wo
    tm, mp, _ = _tiles_m(m)

    # -------- stage 1: conv1 (3x3, stride, pad=1); bias dropped (BN cancels it)
    k1 = 9 * cin
    kp1, tk1, _ = _k_tiling(k1)
    p1, _ = _im2col_3x3(x_bf, strides, kp=kp1, mp=mp)
    w1 = _pad2(params["w1"].reshape(k1, cout).astype(jnp.bfloat16), kp1, cp)
    y1, st1 = _conv_stats_call(p1, w1, tm=tm, tk=tk1)
    sc1, sh1 = _bn_scale_shift(st1, params["bn1_gamma"], params["bn1_beta"],
                               m, cp)

    # -------- stage 2: BN1+ReLU fused (XLA elementwise) into stage-2 im2col;
    #          conv2 (3x3, stride 1, pad=1), bias dropped.
    a1 = jnp.maximum(y1[:m, :cout].astype(jnp.float32) * sc1[:, :cout]
                     + sh1[:, :cout], 0.0)
    a1 = a1.astype(jnp.bfloat16).reshape(n, ho, wo, cout)
    k2 = 9 * cout
    kp2, tk2, _ = _k_tiling(k2)
    p2, _ = _im2col_3x3(a1, 1, kp=kp2, mp=mp)
    w2 = _pad2(params["w2"].reshape(k2, cout).astype(jnp.bfloat16), kp2, cp)
    y2, st2 = _conv_stats_call(p2, w2, tm=tm, tk=tk2)
    sc2, sh2 = _bn_scale_shift(st2, params["bn2_gamma"], params["bn2_beta"],
                               m, cp)

    # -------- epilogue: BN2 (+ shortcut) + ReLU, fused in one tiled kernel ----
    if use_1x1conv:
        cinp = _round_up(cin, _LANE)
        xs = _pad2(x_bf[:, ::strides, ::strides, :].reshape(m, cin), mp, cinp)
        w3 = _pad2(params["w3"].reshape(cin, cout).astype(jnp.bfloat16),
                   cinp, cp)
        b3 = jnp.pad(params["b3"], (0, cp - cout)).reshape(1, cp)
        out = _bn_proj_add_relu_call(y2, xs, w3, b3, sc2, sh2, tm=tm)
    else:
        assert strides == 1 and cin == cout
        res = _pad2(x_bf.reshape(m, cin), mp, cp)
        out = _bn_add_relu_call(y2, res, sc2, sh2, tm=tm)

    out_nhwc = out[:m, :cout].reshape(n, ho, wo, cout)
    return jnp.transpose(out_nhwc, (0, 3, 1, 2))              # NHWC -> NCHW


# ---------------------- pure-JAX reference (for checking) --------------------

def residual_forward_ref(x_nchw, params, *, strides=1, use_1x1conv=False):
    x = jnp.transpose(x_nchw, (0, 2, 3, 1)).astype(jnp.float32)

    def conv(inp, wgt, bias, s, pad):
        y = jax.lax.conv_general_dilated(
            inp, wgt, window_strides=(s, s), padding=((pad, pad), (pad, pad)),
            dimension_numbers=("NHWC", "HWIO", "NHWC"),
            precision=jax.lax.Precision.HIGHEST)
        return y + bias

    def bn(y, gamma, beta):
        mean = jnp.mean(y, axis=(0, 1, 2), keepdims=True)
        var = jnp.mean((y - mean) ** 2, axis=(0, 1, 2), keepdims=True)
        return (y - mean) * jax.lax.rsqrt(var + _BN_EPS) * gamma + beta

    y = jax.nn.relu(bn(conv(x, params["w1"], params["b1"], strides, 1),
                       params["bn1_gamma"], params["bn1_beta"]))
    y = bn(conv(y, params["w2"], params["b2"], 1, 1),
           params["bn2_gamma"], params["bn2_beta"])
    sc = conv(x, params["w3"], params["b3"], strides, 0) if use_1x1conv else x
    out = jax.nn.relu(y + sc)
    return jnp.transpose(out, (0, 3, 1, 2))


# ------------------------------------ main -----------------------------------

if __name__ == "__main__":
    key = jax.random.PRNGKey(0)
    k_x, k_p1, k_p2 = jax.random.split(key, 3)

    x = jax.random.normal(k_x, (2, 4, 16, 16), jnp.float32)   # NCHW input

    # bf16 MXU operands vs f32-HIGHEST reference -> loosened tolerance.
    TOL = dict(atol=5e-2, rtol=5e-2)

    # Case 1: identity shortcut (input_channels == num_channels, stride 1)
    params1 = init_residual_params(k_p1, 4, 4, use_1x1conv=False)
    fwd1 = jax.jit(functools.partial(residual_forward, strides=1,
                                     use_1x1conv=False))
    out1 = jax.block_until_ready(fwd1(x, params1))
    ref1 = residual_forward_ref(x, params1, strides=1, use_1x1conv=False)
    assert out1.shape == (2, 4, 16, 16)
    assert jnp.allclose(out1, ref1, **TOL), float(jnp.max(jnp.abs(out1 - ref1)))

    # Case 2: 1x1-conv shortcut, stride 2, channel change 4 -> 8
    params2 = init_residual_params(k_p2, 4, 8, use_1x1conv=True)
    fwd2 = jax.jit(functools.partial(residual_forward, strides=2,
                                     use_1x1conv=True))
    out2 = jax.block_until_ready(fwd2(x, params2))
    ref2 = residual_forward_ref(x, params2, strides=2, use_1x1conv=True)
    assert out2.shape == (2, 8, 8, 8)
    assert jnp.allclose(out2, ref2, **TOL), float(jnp.max(jnp.abs(out2 - ref2)))

    print("KERNEL_OK")
</pallas_src>

<mosaic_0001>
module attributes {stable_mosaic.version = 11 : i64} {
  func.func @_conv_stats_kernel_1blk(%arg0: i32, %arg1: memref<256x128xbf16, #tpu.memory_space<vmem>>, %arg2: memref<128x128xbf16, #tpu.memory_space<vmem>>, %arg3: memref<256x128xbf16, #tpu.memory_space<vmem>>, %arg4: memref<1x2x128xf32, #tpu.memory_space<vmem>>) attributes {dimension_semantics = [#tpu.dimension_semantics<parallel>], iteration_bounds = array<i64: 2>, scalar_prefetch = 0 : i64, scratch_operands = 0 : i64, tpu.core_type = #tpu.core_type<tc>, window_params = [{transform_indices = @transform_0, window_bounds = array<i64: 256, 128>}, {pipeline_mode = #tpu.pipeline_mode<synchronous>, transform_indices = @transform_1, window_bounds = array<i64: 128, 128>}, {transform_indices = @transform_2, window_bounds = array<i64: 256, 128>}, {transform_indices = @transform_3, window_bounds = array<i64: 1, 2, 128>}]} {
    %c0 = arith.constant 0 : index
    %c0_0 = arith.constant 0 : index
    %0 = vector.load %arg1[%c0, %c0_0] : memref<256x128xbf16, #tpu.memory_space<vmem>>, vector<256x128xbf16>
    %c0_1 = arith.constant 0 : index
    %c0_2 = arith.constant 0 : index
    %1 = vector.load %arg2[%c0_1, %c0_2] : memref<128x128xbf16, #tpu.memory_space<vmem>>, vector<128x128xbf16>
    %cst = arith.constant dense<0.000000e+00> : vector<256x128xf32>
    %2 = tpu.matmul %0, %1, %cst {dimension_numbers = #tpu.dot_dimension_numbers<[1], [0], [0], [1], [0, 0, 1, 1], [], []>} : vector<256x128xbf16>, vector<128x128xbf16>, vector<256x128xf32> -> vector<256x128xf32>
    %3 = arith.truncf %2 : vector<256x128xf32> to vector<256x128xbf16>
    %c0_3 = arith.constant 0 : index
    %c0_4 = arith.constant 0 : index
    %4 = vector.load %arg3[%c0_3, %c0_4] : memref<256x128xbf16, #tpu.memory_space<vmem>>, vector<256x128xbf16>
    tpu.vector_store %arg3[%c0_3, %c0_4], %3 {strides = array<i32>} : memref<256x128xbf16, #tpu.memory_space<vmem>>, vector<256x128xbf16>,
    %cst_5 = arith.constant dense<0.000000e+00> : vector<128xf32>
    %5 = vector.multi_reduction <add>, %2, %cst_5 [0] : vector<256x128xf32> to vector<128xf32>
    %6 = vector.shape_cast %5 : vector<128xf32> to vector<1x128xf32>
    %7 = arith.mulf %2, %2 : vector<256x128xf32>
    %cst_6 = arith.constant dense<0.000000e+00> : vector<128xf32>
    %8 = vector.multi_reduction <add>, %7, %cst_6 [0] : vector<256x128xf32> to vector<128xf32>
    %9 = vector.shape_cast %8 : vector<128xf32> to vector<1x128xf32>
    %10 = tpu.concatenate %6, %9 in 0 : vector<1x128xf32>, vector<1x128xf32> -> vector<2x128xf32>
    %11 = vector.shape_cast %10 : vector<2x128xf32> to vector<1x2x128xf32>
    %c0_7 = arith.constant 0 : index
    %c0_8 = arith.constant 0 : index
    %c0_9 = arith.constant 0 : index
    %12 = vector.load %arg4[%c0_7, %c0_8, %c0_9] : memref<1x2x128xf32, #tpu.memory_space<vmem>>, vector<1x2x128xf32>
    tpu.vector_store %arg4[%c0_7, %c0_8, %c0_9], %11 {strides = array<i32>} : memref<1x2x128xf32, #tpu.memory_space<vmem>>, vector<1x2x128xf32>,
    return
  }
  func.func @transform_0(%arg0: i32) -> (i32, i32) {
    %c0_i32 = arith.constant 0 : i32
    %c0_i32_0 = arith.constant 0 : i32
    return %arg0, %c0_i32 : i32, i32
  }
  func.func @transform_1(%arg0: i32) -> (i32, i32) {
    %c0_i32 = arith.constant 0 : i32
    %c0_i32_0 = arith.constant 0 : i32
    %c0_i32_1 = arith.constant 0 : i32
    return %c0_i32, %c0_i32_0 : i32, i32
  }
  func.func @transform_2(%arg0: i32) -> (i32, i32) {
    %c0_i32 = arith.constant 0 : i32
    %c0_i32_0 = arith.constant 0 : i32
    return %arg0, %c0_i32 : i32, i32
  }
  func.func @transform_3(%arg0: i32) -> (i32, i32, i32) {
    %c0_i32 = arith.constant 0 : i32
    %c0_i32_0 = arith.constant 0 : i32
    %c0_i32_1 = arith.constant 0 : i32
    return %arg0, %c0_i32, %c0_i32_0 : i32, i32, i32
  }
}

module attributes {stable_mosaic.version = 11 : i64} {
  func.func @_bn_add_relu_kernel(%arg0: i32, %arg1: memref<256x128xbf16, #tpu.memory_space<vmem>>, %arg2: memref<256x128xbf16, #tpu.memory_space<vmem>>, %arg3: memref<1x128xf32, #tpu.memory_space<vmem>>, %arg4: memref<1x128xf32, #tpu.memory_space<vmem>>, %arg5: memref<256x128xf32, #tpu.memory_space<vmem>>) attributes {dimension_semantics = [#tpu.dimension_semantics<parallel>], iteration_bounds = array<i64: 2>, scalar_prefetch = 0 : i64, scratch_operands = 0 : i64, tpu.core_type = #tpu.core_type<tc>, window_params = [{transform_indices = @transform_0, window_bounds = array<i64: 256, 128>}, {transform_indices = @transform_1, window_bounds = array<i64: 256, 128>}, {pipeline_mode = #tpu.pipeline_mode<synchronous>, transform_indices = @transform_2, window_bounds = array<i64: 1, 128>}, {pipeline_mode = #tpu.pipeline_mode<synchronous>, transform_indices = @transform_3, window_bounds = array<i64: 1, 128>}, {transform_indices = @transform_4, window_bounds = array<i64: 256, 128>}]} {
    %c0 = arith.constant 0 : index
    %c0_0 = arith.constant 0 : index
    %0 = vector.load %arg1[%c0, %c0_0] : memref<256x128xbf16, #tpu.memory_space<vmem>>, vector<256x128xbf16>
    %1 = arith.extf %0 : vector<256x128xbf16> to vector<256x128xf32>
    %c0_1 = arith.constant 0 : index
    %c0_2 = arith.constant 0 : index
    %2 = vector.load %arg3[%c0_1, %c0_2] : memref<1x128xf32, #tpu.memory_space<vmem>>, vector<1x128xf32>
    %3 = vector.broadcast %2 : vector<1x128xf32> to vector<256x128xf32>
    %4 = arith.mulf %1, %3 : vector<256x128xf32>
    %c0_3 = arith.constant 0 : index
    %c0_4 = arith.constant 0 : index
    %5 = vector.load %arg4[%c0_3, %c0_4] : memref<1x128xf32, #tpu.memory_space<vmem>>, vector<1x128xf32>
    %6 = vector.broadcast %5 : vector<1x128xf32> to vector<256x128xf32>
    %7 = arith.addf %4, %6 : vector<256x128xf32>
    %c0_5 = arith.constant 0 : index
    %c0_6 = arith.constant 0 : index
    %8 = vector.load %arg2[%c0_5, %c0_6] : memref<256x128xbf16, #tpu.memory_space<vmem>>, vector<256x128xbf16>
    %9 = arith.extf %8 : vector<256x128xbf16> to vector<256x128xf32>
    %10 = arith.addf %7, %9 : vector<256x128xf32>
    %cst = arith.constant 0.000000e+00 : f32
    %11 = vector.broadcast %cst : f32 to vector<256x128xf32>
    %12 = arith.maximumf %10, %11 : vector<256x128xf32>
    %c0_7 = arith.constant 0 : index
    %c0_8 = arith.constant 0 : index
    %13 = vector.load %arg5[%c0_7, %c0_8] : memref<256x128xf32, #tpu.memory_space<vmem>>, vector<256x128xf32>
    tpu.vector_store %arg5[%c0_7, %c0_8], %12 {strides = array<i32>} : memref<256x128xf32, #tpu.memory_space<vmem>>, vector<256x128xf32>,
    return
  }
  func.func @transform_0(%arg0: i32) -> (i32, i32) {
    %c0_i32 = arith.constant 0 : i32
    %c0_i32_0 = arith.constant 0 : i32
    return %arg0, %c0_i32 : i32, i32
  }
  func.func @transform_1(%arg0: i32) -> (i32, i32) {
    %c0_i32 = arith.constant 0 : i32
    %c0_i32_0 = arith.constant 0 : i32
    return %arg0, %c0_i32 : i32, i32
  }
  func.func @transform_2(%arg0: i32) -> (i32, i32) {
    %c0_i32 = arith.constant 0 : i32
    %c0_i32_0 = arith.constant 0 : i32
    %c0_i32_1 = arith.constant 0 : i32
    return %c0_i32, %c0_i32_0 : i32, i32
  }
  func.func @transform_3(%arg0: i32) -> (i32, i32) {
    %c0_i32 = arith.constant 0 : i32
    %c0_i32_0 = arith.constant 0 : i32
    %c0_i32_1 = arith.constant 0 : i32
    return %c0_i32, %c0_i32_0 : i32, i32
  }
  func.func @transform_4(%arg0: i32) -> (i32, i32) {
    %c0_i32 = arith.constant 0 : i32
    %c0_i32_0 = arith.constant 0 : i32
    return %arg0, %c0_i32 : i32, i32
  }
}

</mosaic_0001>

<bundles_post_ra>
// kernel: residual_forward.3
= control target key start
LH: loop header
LB: loop body
LE: loop exit
PB: predicated region body
PF: predicated region fallthrough
CT: control target
= control target key end

     0   :  { %s1238_s12 = smov 0   ;;  %s1420_s0 = inlined_call_operand.vmem [shape: bf16[512,128], index: 0, kind: input, shape index: {}]   ;;  %s1421_s1 = inlined_call_operand.vmem [shape: bf16[128,128], index: 1, kind: input, shape index: {}]   ;;  %s1422_s2 = inlined_call_operand.vmem [shape: bf16[512,128], index: 2, kind: output, shape index: {0}]   ;;  %s1423_s3 = inlined_call_operand.vmem [shape: f32[2,2,128], index: 3, kind: output, shape index: {1}]  }
   0x1 LB: > { %s1244_s13 = sadd.s32 4294967295, %s1216_s12   ;;  %p899_p0 = scmp.ge.s32.totalorder %s1216_s12, 1  ;;  %s1216_s12 = sphi %s1238_s12, %s14_s12  }
   0x2   : > { %p141_p1 = scmp.lt.s32.totalorder %s1216_s12, 3 }
   0x4   : > { %p142_p2 = pnand %p899_p0, %p141_p1 }
   0x5   : > { %s900_s16 = sshll.u32 (!%p142_p2), %s1244_s13, 5  ;;  %p181_p4 = scmp.lt.s32.totalorder (!%p142_p2), %s1244_s13, 1 }
   0x6   : > { %145 = sbr.rel (%p142_p2) target bundleno = 321 (0x141), region = 28  ;;  %p170_p3 = scmp.lt.s32.totalorder (!%p142_p2), %s900_s16, 63 }
   0xb   : > { %v1186_v0 = vld [vmem:[%s1421_s1 + $0x38] sm:$0xff]   ;;  %v1187_v1 = vld [vmem:[%s1421_s1 + $0x30] sm:$0xff]   ;;  %s1425_s16 = smov (!%p170_p3, %s900_s16), 63  ;;  %v1188_v2 = vld [vmem:[%s1421_s1 + $0x28] sm:$0xff]   ;;  %s1427_s13 = smov (!%p181_p4, %s1244_s13), 1  ;;  %vm805_vm0 = vcmask 1040384  }
   0xc   : > { %1114 = vmatprep.subr.bf16.mxu0 %v1186_v0  ;;  %1162 = vmatprep.subr.bf16.mxu1 %v1186_v0  ;;  %s901_s21 = sshll.u32 %s1425_s16, 2  ;;  %v1189_v3 = vld [vmem:[%s1421_s1 + $0x20] sm:$0xff]   ;;  %v1190_v5 = vld [vmem:[%s1421_s1 + $0x18] sm:$0xff]   ;;  %v1191_v6 = vld [vmem:[%s1421_s1 + $0x10] sm:$0xff]   ;;  %s904_s11 = sshll.u32 %s1427_s13, 1 }
   0xd   : > { %1115 = vmatpush3.bf16.msra.mxu0 %v1186_v0  ;;  %1170 = vmatpush3.bf16.msra.mxu1 %v1186_v0  ;;  %s1266_s24 = scalar_lea.vmem %s1420_s0, %s901_s21  ;;  %v1192_v8 = vld [vmem:[%s1421_s1 + $0x8] sm:$0xff]   ;;  %v1193_v9 = vld [vmem:[%s1421_s1] sm:$0xff]   ;;  %s1308_s10 = scalar_lea.vmem %s1422_s2, %s901_s21 }
   0xe   : > { %1116 = vmatprep.subr.bf16.mxu0 %v1187_v1  ;;  %1163 = vmatprep.subr.bf16.mxu1 %v1187_v1  ;;  %v1194_v4 = vld [vmem:[%s1266_s24] sm:$0xff]   ;;  %v1195_v10 = vld [vmem:[%s1266_s24 + $0x8] sm:$0xff]   ;;  %v1196_v12 = vld [vmem:[%s1266_s24 + $0x10] sm:$0xff]   ;;  %s184_s16 = scalar_lea.vmem %s1423_s3, %s904_s11 }
   0xf   : > { %1130 = vmatprep.mubr.bf16.mxu0 %v1194_v4  ;;  %v1202_v7 = vld [vmem:[%s1266_s24 + $0x40] sm:$0xff]   ;;  %v1203_v11 = vld [vmem:[%s1266_s24 + $0x48] sm:$0xff]   ;;  %v1204_v13 = vld [vmem:[%s1266_s24 + $0x50] sm:$0xff]  }
  0x10   : > { %1146 = vmatprep.mubr.bf16.mxu1 %v1202_v7  ;;  %v1197_v14 = vld [vmem:[%s1266_s24 + $0x18] sm:$0xff]   ;;  %v1198_v16 = vld [vmem:[%s1266_s24 + $0x20] sm:$0xff]   ;;  %v1199_v18 = vld [vmem:[%s1266_s24 + $0x28] sm:$0xff]  }
  0x11   : > { %1117 = vmatpush3.bf16.msra.mxu0 %v1187_v1  ;;  %1171 = vmatpush3.bf16.msra.mxu1 %v1187_v1  ;;  %v1205_v15 = vld [vmem:[%s1266_s24 + $0x58] sm:$0xff]   ;;  %v1206_v17 = vld [vmem:[%s1266_s24 + $0x60] sm:$0xff]   ;;  %v1207_v19 = vld [vmem:[%s1266_s24 + $0x68] sm:$0xff]  }
  0x12   : > { %1118 = vmatprep.subr.bf16.mxu0 %v1188_v2  ;;  %1164 = vmatprep.subr.bf16.mxu1 %v1188_v2  ;;  %v1200_v20 = vld [vmem:[%s1266_s24 + $0x30] sm:$0xff]   ;;  %v1201_v22 = vld [vmem:[%s1266_s24 + $0x38] sm:$0xff]  }
  0x13   : > { %v1208_v21 = vld [vmem:[%s1266_s24 + $0x70] sm:$0xff]   ;;  %v1209_v23 = vld [vmem:[%s1266_s24 + $0x78] sm:$0xff]  }
  0x15   : > { %1119 = vmatpush3.bf16.msra.mxu0 %v1188_v2  ;;  %1172 = vmatpush3.bf16.msra.mxu1 %v1188_v2 }
  0x16   : > { %1120 = vmatprep.subr.bf16.mxu0 %v1189_v3  ;;  %1165 = vmatprep.subr.bf16.mxu1 %v1189_v3 }
  0x19   : > { %1121 = vmatpush3.bf16.msra.mxu0 %v1189_v3  ;;  %1173 = vmatpush3.bf16.msra.mxu1 %v1189_v3 }
  0x1a   : > { %1122 = vmatprep.subr.bf16.mxu0 %v1190_v5  ;;  %1166 = vmatprep.subr.bf16.mxu1 %v1190_v5 }
  0x1d   : > { %1123 = vmatpush3.bf16.msra.mxu0 %v1190_v5  ;;  %1174 = vmatpush3.bf16.msra.mxu1 %v1190_v5 }
  0x1e   : > { %1124 = vmatprep.subr.bf16.mxu0 %v1191_v6  ;;  %1167 = vmatprep.subr.bf16.mxu1 %v1191_v6 }
  0x21   : > { %1125 = vmatpush3.bf16.msra.mxu0 %v1191_v6  ;;  %1175 = vmatpush3.bf16.msra.mxu1 %v1191_v6 }
  0x22   : > { %1126 = vmatprep.subr.bf16.mxu0 %v1192_v8  ;;  %1168 = vmatprep.subr.bf16.mxu1 %v1192_v8 }
  0x25   : > { %1127 = vmatpush3.bf16.msra.mxu0 %v1192_v8  ;;  %1176 = vmatpush3.bf16.msra.mxu1 %v1192_v8 }
  0x26   : > { %1128 = vmatprep.subr.bf16.mxu0 %v1193_v9  ;;  %1169 = vmatprep.subr.bf16.mxu1 %v1193_v9 }
  0x29   : > { %1129 = vmatpush3.bf16.msra.mxu0 %v1193_v9  ;;  %1177 = vmatpush3.bf16.msra.mxu1 %v1193_v9 }
  0x2c   : > { %1131 = vmatmul.mubr.bf16.vlgmr.msra.gmra.mxu0 %v1195_v10  ;;  %1147 = vmatmul.mubr.bf16.vlgmr.msra.gmra.mxu1 %v1203_v11 }
  0x2d   : > { %1134 = vmatprep.mubr.bf16.mxu0 %v1196_v12  ;;  %1150 = vmatprep.mubr.bf16.mxu1 %v1204_v13 }
  0x34   : > { %1135 = vmatmul.mubr.bf16.gmra.mxu0 %v1197_v14  ;;  %1151 = vmatmul.mubr.bf16.gmra.mxu1 %v1205_v15 }
  0x35   : > { %1138 = vmatprep.mubr.bf16.mxu0 %v1198_v16  ;;  %1154 = vmatprep.mubr.bf16.mxu1 %v1206_v17 }
  0x3c   : > { %1139 = vmatmul.mubr.bf16.gmra.mxu0 %v1199_v18  ;;  %1155 = vmatmul.mubr.bf16.gmra.mxu1 %v1207_v19 }
  0x3d   : > { %1142 = vmatprep.mubr.bf16.mxu0 %v1200_v20  ;;  %1158 = vmatprep.mubr.bf16.mxu1 %v1208_v21 }
  0x44   : > { %1143 = vmatmul.mubr.bf16.gmra.mxu0 %v1201_v22  ;;  %1159 = vmatmul.mubr.bf16.gmra.mxu1 %v1209_v23 }
  0xec   : > { %v1132_v24 = vpop.f32.mrf.mxu0  ;;  %v1299_v25 = vpop.f32.mrf.mxu1 }
  0xed   : > { %v738_v41 = vmul.f32 %v1132_v24, %v1132_v24 }
  0xee   : > { %v412_v26 = vpop.f32.mrf.mxu0  ;;  %v1301_v27 = vpop.f32.mrf.mxu1 }
  0xef   : > { %v736_v32 = vmul.f32 %v412_v26, %v412_v26 }
  0xf0   : > { %v1133_v28 = vpop.f32.mrf.mxu0  ;;  %v1310_v29 = vpop.f32.mrf.mxu1 }
  0xf1   : > { %v1003_v30 = vpack.c.bf16 %v1133_v28, %v1132_v24  ;;  %v1043_v31 = vpack.c.bf16 %v1310_v29, %v1299_v25  ;;  %v739_v46 = vmul.f32 %v1133_v28, %v1133_v28 }
  0xf2   : > { %v415_v33 = vpop.f32.mrf.mxu0  ;;  %v1314_v34 = vpop.f32.mrf.mxu1 }
  0xf3   : > { %1075 = vst [vmem:[%s1308_s10 + $0x8] sm:$0xff] %v1003_v30   ;;  %v998_v35 = vpack.c.bf16 %v415_v33, %v412_v26  ;;  %v699_v36 = vadd.f32 %v415_v33, %v412_v26  ;;  %v737_v37 = vmul.f32 %v415_v33, %v415_v33  ;;  %1083 = vst [vmem:[%s1308_s10 + $0x48] sm:$0xff] %v1043_v31  }
  0xf4   : > { %v1038_v38 = vpack.c.bf16 %v1314_v34, %v1301_v27  ;;  %v1136_v39 = vpop.f32.mrf.mxu0  ;;  %v1320_v40 = vpop.f32.mrf.mxu1 }
  0xf5   : > { %999 = vst [vmem:[%s1308_s10] sm:$0xff] %v998_v35   ;;  %v700_v42 = vadd.f32 %v1132_v24, %v699_v36  ;;  %v768_v43 = vadd.f32 %v737_v37, %v736_v32  ;;  %v742_v1 = vmul.f32 %v1136_v39, %v1136_v39 }
  0xf6   : > { %1082 = vst [vmem:[%s1308_s10 + $0x40] sm:$0xff] %v1038_v38   ;;  %v428_v44 = vpop.f32.mrf.mxu0  ;;  %v1324_v45 = vpop.f32.mrf.mxu1 }
  0xf7   : > { %v769_v47 = vadd.f32 %v768_v43, %v738_v41  ;;  %v701_v48 = vadd.f32 %v1133_v28, %v700_v42  ;;  %v740_v52 = vmul.f32 %v428_v44, %v428_v44 }
  0xf8   : > { %v1137_v49 = vpop.f32.mrf.mxu0  ;;  %v1326_v50 = vpop.f32.mrf.mxu1 }
  0xf9   : > { %v702_v51 = vadd.f32 %v701_v48, %v428_v44  ;;  %v770_v53 = vadd.f32 %v769_v47, %v739_v46  ;;  %v1013_v54 = vpack.c.bf16 %v1137_v49, %v1136_v39  ;;  %v1053_v56 = vpack.c.bf16 %v1326_v50, %v1320_v40 }
  0xfa   : > { %v431_v55 = vpop.f32.mrf.mxu0  ;;  %v1330_v57 = vpop.f32.mrf.mxu1  ;;  %v743_v6 = vmul.f32 %v1137_v49, %v1137_v49 }
  0xfb   : > { %v771_v58 = vadd.f32 %v770_v53, %v740_v52  ;;  %1077 = vst [vmem:[%s1308_s10 + $0x18] sm:$0xff] %v1013_v54   ;;  %v1008_v59 = vpack.c.bf16 %v431_v55, %v428_v44  ;;  %v703_v60 = vadd.f32 %v702_v51, %v431_v55  ;;  %v741_v61 = vmul.f32 %v431_v55, %v431_v55 }
  0xfc   : > { %v1140_v62 = vpop.f32.mrf.mxu0  ;;  %1085 = vst [vmem:[%s1308_s10 + $0x58] sm:$0xff] %v1053_v56   ;;  %v1048_v63 = vpack.c.bf16 %v1330_v57, %v1324_v45  ;;  %v1336_v0 = vpop.f32.mrf.mxu1 }
  0xfd   : > { %1076 = vst [vmem:[%s1308_s10 + $0x10] sm:$0xff] %v1008_v59   ;;  %v704_v2 = vadd.f32 %v1136_v39, %v703_v60  ;;  %v772_v3 = vadd.f32 %v771_v58, %v741_v61  ;;  %v746_v26 = vmul.f32 %v1140_v62, %v1140_v62  ;;  %v752_v61 = vmul.f32 %v1301_v27, %v1301_v27 }
  0xfe   : > { %v444_v4 = vpop.f32.mrf.mxu0  ;;  %1084 = vst [vmem:[%s1308_s10 + $0x50] sm:$0xff] %v1048_v63   ;;  %v1340_v5 = vpop.f32.mrf.mxu1 }
  0xff   : > { %v773_v7 = vadd.f32 %v772_v3, %v742_v1  ;;  %v705_v8 = vadd.f32 %v1137_v49, %v704_v2  ;;  %v744_v12 = vmul.f32 %v444_v4, %v444_v4  ;;  %v753_v2 = vmul.f32 %v1314_v34, %v1314_v34 }
 0x100   : > { %v1141_v9 = vpop.f32.mrf.mxu0  ;;  %v1342_v10 = vpop.f32.mrf.mxu1 }
 0x101   : > { %v706_v11 = vadd.f32 %v705_v8, %v444_v4  ;;  %v774_v13 = vadd.f32 %v773_v7, %v743_v6  ;;  %v1023_v14 = vpack.c.bf16 %v1141_v9, %v1140_v62  ;;  %v1063_v16 = vpack.c.bf16 %v1342_v10, %v1336_v0 }
 0x102   : > { %v447_v15 = vpop.f32.mrf.mxu0  ;;  %v1346_v17 = vpop.f32.mrf.mxu1  ;;  %v747_v33 = vmul.f32 %v1141_v9, %v1141_v9  ;;  %v755_v8 = vmul.f32 %v1310_v29, %v1310_v29 }
 0x103   : > { %v775_v18 = vadd.f32 %v774_v13, %v744_v12  ;;  %1079 = vst [vmem:[%s1308_s10 + $0x28] sm:$0xff] %v1023_v14   ;;  %v1018_v19 = vpack.c.bf16 %v447_v15, %v444_v4  ;;  %v707_v20 = vadd.f32 %v706_v11, %v447_v15  ;;  %v745_v21 = vmul.f32 %v447_v15, %v447_v15 }
 0x104   : > { %v1144_v22 = vpop.f32.mrf.mxu0  ;;  %1087 = vst [vmem:[%s1308_s10 + $0x68] sm:$0xff] %v1063_v16   ;;  %v1058_v23 = vpack.c.bf16 %v1346_v17, %v1340_v5  ;;  %v1352_v24 = vpop.f32.mrf.mxu1  ;;  %v754_v4 = vmul.f32 %v1299_v25, %v1299_v25  ;;  %v756_v12 = vmul.f32 %v1324_v45, %v1324_v45  ;;  %v757_v15 = vmul.f32 %v1330_v57, %v1330_v57 }
 0x105   : > { %1078 = vst [vmem:[%s1308_s10 + $0x20] sm:$0xff] %v1018_v19   ;;  %v708_v28 = vadd.f32 %v1140_v62, %v707_v20  ;;  %v776_v30 = vadd.f32 %v775_v18, %v745_v21  ;;  %v750_v54 = vmul.f32 %v1144_v22, %v1144_v22  ;;  %v760_v21 = vmul.f32 %v1340_v5, %v1340_v5 }
 0x106   : > { %v460_v31 = vpop.f32.mrf.mxu0  ;;  %1086 = vst [vmem:[%s1308_s10 + $0x60] sm:$0xff] %v1058_v23   ;;  %v1356_v32 = vpop.f32.mrf.mxu1 }
 0x107   : > { %v777_v35 = vadd.f32 %v776_v30, %v746_v26  ;;  %v709_v36 = vadd.f32 %v1141_v9, %v708_v28  ;;  %v748_v41 = vmul.f32 %v460_v31, %v460_v31  ;;  %v761_v26 = vmul.f32 %v1346_v17, %v1346_v17 }
 0x108   : > { %v1145_v37 = vpop.f32.mrf.mxu0  ;;  %v1358_v38 = vpop.f32.mrf.mxu1 }
 0x109   : > { %v710_v39 = vadd.f32 %v709_v36, %v460_v31  ;;  %v778_v42 = vadd.f32 %v777_v35, %v747_v33  ;;  %v1033_v43 = vpack.c.bf16 %v1145_v37, %v1144_v22  ;;  %v1073_v46 = vpack.c.bf16 %v1358_v38, %v1352_v24 }
 0x10a   : > { %v463_v44 = vpop.f32.mrf.mxu0  ;;  %v527_v47 = vpop.f32.mrf.mxu1  ;;  %v751_v58 = vmul.f32 %v1145_v37, %v1145_v37  ;;  %v764_v35 = vmul.f32 %v1356_v32, %v1356_v32 }
 0x10b   : > { %v779_v48 = vadd.f32 %v778_v42, %v748_v41  ;;  %1081 = vst [vmem:[%s1308_s10 + $0x38] sm:$0xff] %v1033_v43   ;;  %v1028_v49 = vpack.c.bf16 %v463_v44, %v460_v31  ;;  %v711_v51 = vadd.f32 %v710_v39, %v463_v44  ;;  %v749_v52 = vmul.f32 %v463_v44, %v463_v44 }
 0x10c   : > { %1089 = vst [vmem:[%s1308_s10 + $0x78] sm:$0xff] %v1073_v46   ;;  %v1068_v53 = vpack.c.bf16 %v527_v47, %v1356_v32  ;;  %v765_v39 = vmul.f32 %v527_v47, %v527_v47  ;;  %v767_v43 = vmul.f32 %v1358_v38, %v1358_v38 }
 0x10d   : > { %1080 = vst [vmem:[%s1308_s10 + $0x30] sm:$0xff] %v1028_v49   ;;  %v712_v55 = vadd.f32 %v1144_v22, %v711_v51  ;;  %v780_v56 = vadd.f32 %v779_v48, %v749_v52 }
 0x10e   : > { %1088 = vst [vmem:[%s1308_s10 + $0x70] sm:$0xff] %v1068_v53  }
 0x10f   : > { %v713_v59 = vadd.f32 %v1145_v37, %v712_v55  ;;  %v781_v60 = vadd.f32 %v780_v56, %v750_v54 }
 0x111   : > { %v782_v62 = vadd.f32 %v781_v60, %v751_v58  ;;  %v714_v63 = vadd.f32 %v713_v59, %v1301_v27 }
 0x113   : > { %v715_v1 = vadd.f32 %v714_v63, %v1314_v34  ;;  %v783_v3 = vadd.f32 %v782_v62, %v752_v61 }
 0x115   : > { %v716_v6 = vadd.f32 %v1299_v25, %v715_v1  ;;  %v784_v7 = vadd.f32 %v783_v3, %v753_v2  ;;  %v758_v25 = vmul.f32 %v1320_v40, %v1320_v40 }
 0x117   : > { %v785_v9 = vadd.f32 %v784_v7, %v754_v4  ;;  %v717_v11 = vadd.f32 %v1310_v29, %v716_v6  ;;  %v759_v29 = vmul.f32 %v1326_v50, %v1326_v50 }
 0x119   : > { %v718_v27 = vadd.f32 %v717_v11, %v1324_v45  ;;  %v786_v13 = vadd.f32 %v785_v9, %v755_v8 }
 0x11b   : > { %v787_v34 = vadd.f32 %v786_v13, %v756_v12  ;;  %v719_v14 = vadd.f32 %v718_v27, %v1330_v57 }
 0x11d   : > { %v720_v16 = vadd.f32 %v1320_v40, %v719_v14  ;;  %v788_v18 = vadd.f32 %v787_v34, %v757_v15  ;;  %v762_v40 = vmul.f32 %v1336_v0, %v1336_v0 }
 0x11f   : > { %v789_v19 = vadd.f32 %v788_v18, %v758_v25  ;;  %v721_v20 = vadd.f32 %v1326_v50, %v720_v16  ;;  %v763_v50 = vmul.f32 %v1342_v10, %v1342_v10 }
 0x121   : > { %v722_v45 = vadd.f32 %v721_v20, %v1340_v5  ;;  %v790_v22 = vadd.f32 %v789_v19, %v759_v29 }
 0x123   : > { %v791_v23 = vadd.f32 %v790_v22, %v760_v21  ;;  %v723_v57 = vadd.f32 %v722_v45, %v1346_v17 }
 0x125   : > { %v724_v28 = vadd.f32 %v1336_v0, %v723_v57  ;;  %v792_v30 = vadd.f32 %v791_v23, %v761_v26  ;;  %v766_v0 = vmul.f32 %v1352_v24, %v1352_v24 }
 0x127   : > { %v793_v31 = vadd.f32 %v792_v30, %v762_v40  ;;  %v725_v5 = vadd.f32 %v1342_v10, %v724_v28 }
 0x129   : > { %v726_v33 = vadd.f32 %v725_v5, %v1356_v32  ;;  %v794_v36 = vadd.f32 %v793_v31, %v763_v50 }
 0x12b   : > { %v795_v17 = vadd.f32 %v794_v36, %v764_v35  ;;  %v727_v37 = vadd.f32 %v726_v33, %v527_v47 }
 0x12d   : > { %v728_v41 = vadd.f32 %v1352_v24, %v727_v37  ;;  %v796_v42 = vadd.f32 %v795_v17, %v765_v39 }
 0x12f   : > { %v729_v10 = vadd.f32 %v1358_v38, %v728_v41  ;;  %v797_v44 = vadd.f32 %v796_v42, %v766_v0 }
 0x131   : > { %v730_v46 = vrot.slane %v729_v10, 4  ;;  %v798_v48 = vadd.f32 %v797_v44, %v767_v43 }
 0x133   : > { %v731_v32 = vadd.f32 %v730_v46, %v729_v10  ;;  %v799_v49 = vrot.slane %v798_v48, 4 }
 0x135   : > { %v732_v51 = vrot.slane %v731_v32, 2  ;;  %v800_v52 = vadd.f32 %v799_v49, %v798_v48 }
 0x137   : > { %v733_v47 = vadd.f32 %v732_v51, %v731_v32  ;;  %v801_v53 = vrot.slane %v800_v52, 2 }
 0x139   : > { %v734_v54 = vrot.slane %v733_v47, 1  ;;  %v802_v55 = vadd.f32 %v801_v53, %v800_v52 }
 0x13b   : > { %v803_v24 = vrot.slane %v802_v55, 1  ;;  %v735_v38 = vadd.f32 %v734_v54, %v733_v47 }
 0x13d   : > { %v804_v56 = vadd.f32 %v803_v24, %v802_v55 }
 0x13f   : > { %v806_v58 = vsel %vm805_vm0, %v735_v38, %v804_v56 }
 0x140   : > { %807 = vst [vmem:[%s184_s16] sm:$0x3] %v806_v58 }
 0x141 PF: > { %s14_s12 = sadd.s32 1, %s1216_s12  }
 0x142   : > { %p11_p5 = scmp.ge.s32.totalorder %s14_s12, 4  }
 0x144   :  { %13 = sbr.rel (!%p11_p5) target bundleno = 1 (0x1), region = 70 }

// kernel: residual_forward.5
= control target key start
LH: loop header
LB: loop body
LE: loop exit
PB: predicated region body
PF: predicated region fallthrough
CT: control target
= control target key end

     0   :  { %s807_s15 = smov 0   ;;  %s975_s0 = inlined_call_operand.vmem [shape: bf16[512,128], index: 0, kind: input, shape index: {}]   ;;  %s976_s1 = inlined_call_operand.vmem [shape: bf16[512,128], index: 1, kind: input, shape index: {}]   ;;  %s977_s2 = inlined_call_operand.vmem [shape: f32[1,128], index: 2, kind: input, shape index: {}]   ;;  %s978_s3 = inlined_call_operand.vmem [shape: f32[1,128], index: 3, kind: input, shape index: {}]   ;;  %s979_s4 = inlined_call_operand.vmem [shape: f32[512,128], index: 4, kind: output, shape index: {}]  }
   0x1 LB: > { %s593_s16 = sadd.s32 4294967295, %s780_s15   ;;  %p597_p0 = scmp.ge.s32.totalorder %s780_s15, 1  ;;  %s780_s15 = sphi %s807_s15, %s14_s15  }
   0x2   : > { %p174_p1 = scmp.lt.s32.totalorder %s780_s15, 3 }
   0x4   : > { %p175_p2 = pnand %p597_p0, %p174_p1 }
   0x5   : > { %s598_s17 = sshll.u32 (!%p175_p2), %s593_s16, 5 }
   0x6   : > { %178 = sbr.rel (%p175_p2) target bundleno = 69 (0x45), region = 36  ;;  %p206_p3 = scmp.lt.s32.totalorder (!%p175_p2), %s598_s17, 63 }
   0xb   : > { %s981_s17 = smov (!%p206_p3, %s598_s17), 63  ;;  %v831_v0 = vld [vmem:[%s977_s2] ss:$0 sm:$0xff] }
   0xc   : > { %s599_s18 = sshll.u32 %s981_s17, 2  ;;  %v842_v11 = vld [vmem:[%s978_s3] ss:$0 sm:$0xff]  ;;  %s603_s29 = sshll.u32 %s981_s17, 3 }
   0xd   : > { %s821_s21 = scalar_lea.vmem %s975_s0, %s599_s18  ;;  %s826_s24 = scalar_lea.vmem %s976_s1, %s599_s18 }
   0xe   : > { %v609_v1 = vld [vmem:[%s821_s21] sm:$0xff]   ;;  %v736_v3 = vld [vmem:[%s821_s21 + $0x8] sm:$0xff]   ;;  %v737_v9 = vld [vmem:[%s821_s21 + $0x10] sm:$0xff]   ;;  %s862_s6 = scalar_lea.vmem %s979_s4, %s603_s29 }
   0xf   : > { %v673_v2 = vld [vmem:[%s826_s24] sm:$0xff]   ;;  %v610_v4 = vunpack.c.l.bf16 %v609_v1  ;;  %v611_v6 = vunpack.c.h.bf16 %v609_v1  ;;  %v751_v8 = vld [vmem:[%s826_s24 + $0x8] sm:$0xff]   ;;  %v752_v10 = vld [vmem:[%s826_s24 + $0x10] sm:$0xff]   ;;  %v614_v12 = vunpack.c.l.bf16 %v736_v3  ;;  %v615_v14 = vunpack.c.h.bf16 %v736_v3 }
  0x10   : > { %v674_v5 = vunpack.c.l.bf16 %v673_v2  ;;  %v675_v7 = vunpack.c.h.bf16 %v673_v2  ;;  %v678_v13 = vunpack.c.l.bf16 %v751_v8  ;;  %v679_v15 = vunpack.c.h.bf16 %v751_v8  ;;  %v738_v16 = vld [vmem:[%s821_s21 + $0x18] sm:$0xff]   ;;  %v739_v42 = vld [vmem:[%s821_s21 + $0x20] sm:$0xff]   ;;  %v740_v52 = vld [vmem:[%s821_s21 + $0x28] sm:$0xff]  }
  0x11   : > { %v294_v17 = vmul.f32 %v610_v4, %v831_v0  ;;  %v295_v18 = vmul.f32 %v611_v6, %v831_v0  ;;  %v618_v19 = vunpack.c.l.bf16 %v737_v9  ;;  %v682_v20 = vunpack.c.l.bf16 %v752_v10  ;;  %v753_v21 = vld [vmem:[%s826_s24 + $0x18] sm:$0xff]   ;;  %v754_v47 = vld [vmem:[%s826_s24 + $0x20] sm:$0xff]   ;;  %v755_v57 = vld [vmem:[%s826_s24 + $0x28] sm:$0xff]  }
  0x12   : > { %v296_v22 = vmul.f32 %v614_v12, %v831_v0  ;;  %v297_v23 = vmul.f32 %v615_v14, %v831_v0  ;;  %v619_v24 = vunpack.c.h.bf16 %v737_v9  ;;  %v683_v25 = vunpack.c.h.bf16 %v752_v10  ;;  %v741_v62 = vld [vmem:[%s821_s21 + $0x30] sm:$0xff]   ;;  %v742_v14 = vld [vmem:[%s821_s21 + $0x38] sm:$0xff]  }
  0x13   : > { %v333_v26 = vadd.f32 %v842_v11, %v294_v17  ;;  %v334_v27 = vadd.f32 %v842_v11, %v295_v18  ;;  %v298_v28 = vmul.f32 %v618_v19, %v831_v0  ;;  %v622_v29 = vunpack.c.l.bf16 %v738_v16  ;;  %v756_v4 = vld [vmem:[%s826_s24 + $0x30] sm:$0xff]  }
  0x14   : > { %v335_v30 = vadd.f32 %v842_v11, %v296_v22  ;;  %v336_v31 = vadd.f32 %v842_v11, %v297_v23  ;;  %v299_v32 = vmul.f32 %v619_v24, %v831_v0  ;;  %v686_v33 = vunpack.c.l.bf16 %v753_v21  ;;  %v757_v23 = vld [vmem:[%s826_s24 + $0x38] sm:$0xff]  }
  0x15   : > { %v429_v34 = vadd.f32 %v674_v5, %v333_v26  ;;  %v430_v35 = vadd.f32 %v675_v7, %v334_v27  ;;  %v337_v36 = vadd.f32 %v842_v11, %v298_v28  ;;  %v300_v37 = vmul.f32 %v622_v29, %v831_v0 }
  0x16   : > { %v431_v38 = vadd.f32 %v678_v13, %v335_v30  ;;  %v432_v39 = vadd.f32 %v679_v15, %v336_v31  ;;  %v338_v40 = vadd.f32 %v842_v11, %v299_v32  ;;  %v623_v41 = vunpack.c.h.bf16 %v738_v16  ;;  %v743_v32 = vld [vmem:[%s821_s21 + $0x40] sm:$0xff]  }
  0x17   : > { %v461_v43 = vmax.f32 %v429_v34, 0.0  ;;  %v462_v44 = vmax.f32 %v430_v35, 0.0  ;;  %v433_v45 = vadd.f32 %v682_v20, %v337_v36  ;;  %v339_v46 = vadd.f32 %v842_v11, %v300_v37  ;;  %v758_v37 = vld [vmem:[%s826_s24 + $0x40] sm:$0xff]  }
  0x18   : > { %v463_v48 = vmax.f32 %v431_v38, 0.0  ;;  %v464_v49 = vmax.f32 %v432_v39, 0.0  ;;  %v434_v50 = vadd.f32 %v683_v25, %v338_v40  ;;  %v301_v51 = vmul.f32 %v623_v41, %v831_v0 }
  0x19   : > { %493 = vst [vmem:[%s862_s6] sm:$0xff] %v461_v43  ;;  %494 = vst [vmem:[%s862_s6 + $0x8] sm:$0xff] %v462_v44  ;;  %v465_v53 = vmax.f32 %v433_v45, 0.0  ;;  %v435_v54 = vadd.f32 %v686_v33, %v339_v46  ;;  %v687_v55 = vunpack.c.h.bf16 %v753_v21  ;;  %v626_v56 = vunpack.c.l.bf16 %v739_v42  ;;  %v744_v46 = vld [vmem:[%s821_s21 + $0x48] sm:$0xff]  }
  0x1a   : > { %495 = vst [vmem:[%s862_s6 + $0x10] sm:$0xff] %v463_v48  ;;  %496 = vst [vmem:[%s862_s6 + $0x18] sm:$0xff] %v464_v49  ;;  %v466_v58 = vmax.f32 %v434_v50, 0.0  ;;  %v340_v59 = vadd.f32 %v842_v11, %v301_v51  ;;  %v690_v60 = vunpack.c.l.bf16 %v754_v47  ;;  %v627_v61 = vunpack.c.h.bf16 %v739_v42 }
  0x1b   : > { %497 = vst [vmem:[%s862_s6 + $0x20] sm:$0xff] %v465_v53  ;;  %v467_v63 = vmax.f32 %v435_v54, 0.0  ;;  %v302_v1 = vmul.f32 %v626_v56, %v831_v0  ;;  %v691_v2 = vunpack.c.h.bf16 %v754_v47  ;;  %v630_v3 = vunpack.c.l.bf16 %v740_v52  ;;  %v759_v47 = vld [vmem:[%s826_s24 + $0x48] sm:$0xff]   ;;  %v745_v56 = vld [vmem:[%s821_s21 + $0x50] sm:$0xff]  }
  0x1c   : > { %498 = vst [vmem:[%s862_s6 + $0x28] sm:$0xff] %v466_v58  ;;  %v436_v5 = vadd.f32 %v687_v55, %v340_v59  ;;  %v303_v6 = vmul.f32 %v627_v61, %v831_v0  ;;  %v694_v7 = vunpack.c.l.bf16 %v755_v57  ;;  %v631_v8 = vunpack.c.h.bf16 %v740_v52  ;;  %v760_v61 = vld [vmem:[%s826_s24 + $0x50] sm:$0xff]  }
  0x1d   : > { %499 = vst [vmem:[%s862_s6 + $0x30] sm:$0xff] %v467_v63  ;;  %v341_v9 = vadd.f32 %v842_v11, %v302_v1  ;;  %v304_v10 = vmul.f32 %v630_v3, %v831_v0  ;;  %v695_v12 = vunpack.c.h.bf16 %v755_v57  ;;  %v634_v13 = vunpack.c.l.bf16 %v741_v62 }
  0x1e   : > { %v468_v15 = vmax.f32 %v436_v5, 0.0  ;;  %v342_v16 = vadd.f32 %v842_v11, %v303_v6  ;;  %v305_v17 = vmul.f32 %v631_v8, %v831_v0  ;;  %v698_v18 = vunpack.c.l.bf16 %v756_v4 }
  0x1f   : > { %v437_v19 = vadd.f32 %v690_v60, %v341_v9  ;;  %v343_v20 = vadd.f32 %v842_v11, %v304_v10  ;;  %v306_v21 = vmul.f32 %v634_v13, %v831_v0  ;;  %v635_v22 = vunpack.c.h.bf16 %v741_v62 }
  0x20   : > { %500 = vst [vmem:[%s862_s6 + $0x38] sm:$0xff] %v468_v15  ;;  %v438_v24 = vadd.f32 %v691_v2, %v342_v16  ;;  %v344_v25 = vadd.f32 %v842_v11, %v305_v17  ;;  %v699_v26 = vunpack.c.h.bf16 %v756_v4  ;;  %v638_v27 = vunpack.c.l.bf16 %v742_v14  ;;  %v761_v17 = vld [vmem:[%s826_s24 + $0x58] sm:$0xff]  }
  0x21   : > { %v469_v28 = vmax.f32 %v437_v19, 0.0  ;;  %v439_v29 = vadd.f32 %v694_v7, %v343_v20  ;;  %v345_v30 = vadd.f32 %v842_v11, %v306_v21  ;;  %v307_v31 = vmul.f32 %v635_v22, %v831_v0 }
  0x22   : > { %v470_v33 = vmax.f32 %v438_v24, 0.0  ;;  %v440_v34 = vadd.f32 %v695_v12, %v344_v25  ;;  %v308_v35 = vmul.f32 %v638_v27, %v831_v0  ;;  %v702_v36 = vunpack.c.l.bf16 %v757_v23  ;;  %v746_v12 = vld [vmem:[%s821_s21 + $0x58] sm:$0xff]  }
  0x23   : > { %501 = vst [vmem:[%s862_s6 + $0x40] sm:$0xff] %v469_v28  ;;  %v471_v38 = vmax.f32 %v439_v29, 0.0  ;;  %v441_v39 = vadd.f32 %v698_v18, %v345_v30  ;;  %v346_v40 = vadd.f32 %v842_v11, %v307_v31  ;;  %v639_v41 = vunpack.c.h.bf16 %v742_v14  ;;  %v762_v31 = vld [vmem:[%s826_s24 + $0x60] sm:$0xff]  }
  0x24   : > { %502 = vst [vmem:[%s862_s6 + $0x48] sm:$0xff] %v470_v33  ;;  %v472_v42 = vmax.f32 %v440_v34, 0.0  ;;  %v347_v43 = vadd.f32 %v842_v11, %v308_v35  ;;  %v703_v44 = vunpack.c.h.bf16 %v757_v23  ;;  %v642_v45 = vunpack.c.l.bf16 %v743_v32 }
  0x25   : > { %503 = vst [vmem:[%s862_s6 + $0x50] sm:$0xff] %v471_v38  ;;  %v473_v48 = vmax.f32 %v441_v39, 0.0  ;;  %v442_v49 = vadd.f32 %v699_v26, %v346_v40  ;;  %v309_v50 = vmul.f32 %v639_v41, %v831_v0  ;;  %v706_v51 = vunpack.c.l.bf16 %v758_v37  ;;  %v747_v26 = vld [vmem:[%s821_s21 + $0x60] sm:$0xff]   ;;  %v748_v40 = vld [vmem:[%s821_s21 + $0x68] sm:$0xff]  }
  0x26   : > { %504 = vst [vmem:[%s862_s6 + $0x58] sm:$0xff] %v472_v42  ;;  %v443_v52 = vadd.f32 %v702_v36, %v347_v43  ;;  %v310_v53 = vmul.f32 %v642_v45, %v831_v0  ;;  %v643_v54 = vunpack.c.h.bf16 %v743_v32  ;;  %v707_v55 = vunpack.c.h.bf16 %v758_v37  ;;  %v763_v41 = vld [vmem:[%s826_s24 + $0x68] sm:$0xff]  }
  0x27   : > { %505 = vst [vmem:[%s862_s6 + $0x60] sm:$0xff] %v473_v48  ;;  %v474_v57 = vmax.f32 %v442_v49, 0.0  ;;  %v348_v58 = vadd.f32 %v842_v11, %v309_v50  ;;  %v646_v59 = vunpack.c.l.bf16 %v744_v46  ;;  %v710_v60 = vunpack.c.l.bf16 %v759_v47  ;;  %v749_v50 = vld [vmem:[%s821_s21 + $0x70] sm:$0xff]  }
  0x28   : > { %v475_v62 = vmax.f32 %v443_v52, 0.0  ;;  %v349_v63 = vadd.f32 %v842_v11, %v310_v53  ;;  %v311_v1 = vmul.f32 %v643_v54, %v831_v0  ;;  %v647_v2 = vunpack.c.h.bf16 %v744_v46 }
  0x29   : > { %506 = vst [vmem:[%s862_s6 + $0x68] sm:$0xff] %v474_v57  ;;  %v444_v3 = vadd.f32 %v703_v44, %v348_v58  ;;  %v312_v4 = vmul.f32 %v646_v59, %v831_v0  ;;  %v711_v5 = vunpack.c.h.bf16 %v759_v47  ;;  %v650_v6 = vunpack.c.l.bf16 %v745_v56  ;;  %v764_v59 = vld [vmem:[%s826_s24 + $0x70] sm:$0xff]  }
  0x2a   : > { %507 = vst [vmem:[%s862_s6 + $0x70] sm:$0xff] %v475_v62  ;;  %v445_v7 = vadd.f32 %v706_v51, %v349_v63  ;;  %v350_v8 = vadd.f32 %v842_v11, %v311_v1  ;;  %v313_v9 = vmul.f32 %v647_v2, %v831_v0  ;;  %v714_v10 = vunpack.c.l.bf16 %v760_v61 }
  0x2b   : > { %v476_v13 = vmax.f32 %v444_v3, 0.0  ;;  %v351_v14 = vadd.f32 %v842_v11, %v312_v4  ;;  %v314_v15 = vmul.f32 %v650_v6, %v831_v0  ;;  %v651_v16 = vunpack.c.h.bf16 %v745_v56 }
  0x2c   : > { %v477_v18 = vmax.f32 %v445_v7, 0.0  ;;  %v446_v19 = vadd.f32 %v707_v55, %v350_v8  ;;  %v352_v20 = vadd.f32 %v842_v11, %v313_v9  ;;  %v715_v21 = vunpack.c.h.bf16 %v760_v61 }
  0x2d   : > { %508 = vst [vmem:[%s862_s6 + $0x78] sm:$0xff] %v476_v13  ;;  %v447_v22 = vadd.f32 %v710_v60, %v351_v14  ;;  %v353_v23 = vadd.f32 %v842_v11, %v314_v15  ;;  %v315_v24 = vmul.f32 %v651_v16, %v831_v0  ;;  %v654_v25 = vunpack.c.l.bf16 %v746_v12 }
  0x2e   : > { %509 = vst [vmem:[%s862_s6 + $0x80] sm:$0xff] %v477_v18  ;;  %v478_v27 = vmax.f32 %v446_v19, 0.0  ;;  %v448_v28 = vadd.f32 %v711_v5, %v352_v20  ;;  %v718_v29 = vunpack.c.l.bf16 %v761_v17  ;;  %v655_v30 = vunpack.c.h.bf16 %v746_v12  ;;  %v750_v5 = vld [vmem:[%s821_s21 + $0x78] sm:$0xff]  }
  0x2f   : > { %v479_v32 = vmax.f32 %v447_v22, 0.0  ;;  %v449_v33 = vadd.f32 %v714_v10, %v353_v23  ;;  %v354_v34 = vadd.f32 %v842_v11, %v315_v24  ;;  %v316_v35 = vmul.f32 %v654_v25, %v831_v0  ;;  %v765_v10 = vld [vmem:[%s826_s24 + $0x78] sm:$0xff]  }
  0x30   : > { %510 = vst [vmem:[%s862_s6 + $0x88] sm:$0xff] %v478_v27  ;;  %v480_v36 = vmax.f32 %v448_v28, 0.0  ;;  %v317_v37 = vmul.f32 %v655_v30, %v831_v0  ;;  %v719_v38 = vunpack.c.h.bf16 %v761_v17  ;;  %v658_v39 = vunpack.c.l.bf16 %v747_v26 }
  0x31   : > { %511 = vst [vmem:[%s862_s6 + $0x90] sm:$0xff] %v479_v32  ;;  %v481_v42 = vmax.f32 %v449_v33, 0.0  ;;  %v450_v43 = vadd.f32 %v715_v21, %v354_v34  ;;  %v355_v44 = vadd.f32 %v842_v11, %v316_v35  ;;  %v722_v45 = vunpack.c.l.bf16 %v762_v31 }
  0x32   : > { %512 = vst [vmem:[%s862_s6 + $0x98] sm:$0xff] %v480_v36  ;;  %v356_v46 = vadd.f32 %v842_v11, %v317_v37  ;;  %v318_v47 = vmul.f32 %v658_v39, %v831_v0  ;;  %v659_v48 = vunpack.c.h.bf16 %v747_v26  ;;  %v723_v49 = vunpack.c.h.bf16 %v762_v31 }
  0x33   : > { %513 = vst [vmem:[%s862_s6 + $0xa0] sm:$0xff] %v481_v42  ;;  %v482_v51 = vmax.f32 %v450_v43, 0.0  ;;  %v451_v52 = vadd.f32 %v718_v29, %v355_v44  ;;  %v662_v53 = vunpack.c.l.bf16 %v748_v40  ;;  %v726_v54 = vunpack.c.l.bf16 %v763_v41 }
  0x34   : > { %v452_v55 = vadd.f32 %v719_v38, %v356_v46  ;;  %v357_v56 = vadd.f32 %v842_v11, %v318_v47  ;;  %v319_v57 = vmul.f32 %v659_v48, %v831_v0  ;;  %v663_v58 = vunpack.c.h.bf16 %v748_v40 }
  0x35   : > { %514 = vst [vmem:[%s862_s6 + $0xa8] sm:$0xff] %v482_v51  ;;  %v483_v60 = vmax.f32 %v451_v52, 0.0  ;;  %v320_v61 = vmul.f32 %v662_v53, %v831_v0  ;;  %v727_v62 = vunpack.c.h.bf16 %v763_v41  ;;  %v666_v63 = vunpack.c.l.bf16 %v749_v50 }
  0x36   : > { %v484_v1 = vmax.f32 %v452_v55, 0.0  ;;  %v453_v2 = vadd.f32 %v722_v45, %v357_v56  ;;  %v358_v3 = vadd.f32 %v842_v11, %v319_v57  ;;  %v321_v4 = vmul.f32 %v663_v58, %v831_v0 }
  0x37   : > { %515 = vst [vmem:[%s862_s6 + $0xb0] sm:$0xff] %v483_v60  ;;  %v359_v6 = vadd.f32 %v842_v11, %v320_v61  ;;  %v322_v7 = vmul.f32 %v666_v63, %v831_v0  ;;  %v730_v8 = vunpack.c.l.bf16 %v764_v59  ;;  %v667_v9 = vunpack.c.h.bf16 %v749_v50 }
  0x38   : > { %516 = vst [vmem:[%s862_s6 + $0xb8] sm:$0xff] %v484_v1  ;;  %v485_v12 = vmax.f32 %v453_v2, 0.0  ;;  %v454_v13 = vadd.f32 %v723_v49, %v358_v3  ;;  %v360_v14 = vadd.f32 %v842_v11, %v321_v4  ;;  %v731_v15 = vunpack.c.h.bf16 %v764_v59 }
  0x39   : > { %v455_v16 = vadd.f32 %v726_v54, %v359_v6  ;;  %v361_v17 = vadd.f32 %v842_v11, %v322_v7  ;;  %v323_v18 = vmul.f32 %v667_v9, %v831_v0  ;;  %v670_v19 = vunpack.c.l.bf16 %v750_v5 }
  0x3a   : > { %517 = vst [vmem:[%s862_s6 + $0xc0] sm:$0xff] %v485_v12  ;;  %v486_v20 = vmax.f32 %v454_v13, 0.0  ;;  %v456_v21 = vadd.f32 %v727_v62, %v360_v14  ;;  %v734_v22 = vunpack.c.l.bf16 %v765_v10  ;;  %v671_v23 = vunpack.c.h.bf16 %v750_v5 }
  0x3b   : > { %v487_v24 = vmax.f32 %v455_v16, 0.0  ;;  %v457_v25 = vadd.f32 %v730_v8, %v361_v17  ;;  %v362_v26 = vadd.f32 %v842_v11, %v323_v18  ;;  %v324_v27 = vmul.f32 %v670_v19, %v831_v0 }
  0x3c   : > { %518 = vst [vmem:[%s862_s6 + $0xc8] sm:$0xff] %v486_v20  ;;  %v488_v28 = vmax.f32 %v456_v21, 0.0  ;;  %v325_v29 = vmul.f32 %v671_v23, %v831_v0  ;;  %v735_v30 = vunpack.c.h.bf16 %v765_v10 }
  0x3d   : > { %519 = vst [vmem:[%s862_s6 + $0xd0] sm:$0xff] %v487_v24  ;;  %v489_v31 = vmax.f32 %v457_v25, 0.0  ;;  %v458_v32 = vadd.f32 %v731_v15, %v362_v26  ;;  %v363_v33 = vadd.f32 %v842_v11, %v324_v27 }
  0x3e   : > { %520 = vst [vmem:[%s862_s6 + $0xd8] sm:$0xff] %v488_v28  ;;  %v364_v34 = vadd.f32 %v842_v11, %v325_v29 }
  0x3f   : > { %521 = vst [vmem:[%s862_s6 + $0xe0] sm:$0xff] %v489_v31  ;;  %v490_v35 = vmax.f32 %v458_v32, 0.0  ;;  %v459_v36 = vadd.f32 %v734_v22, %v363_v33 }
  0x40   : > { %v460_v37 = vadd.f32 %v735_v30, %v364_v34 }
  0x41   : > { %522 = vst [vmem:[%s862_s6 + $0xe8] sm:$0xff] %v490_v35  ;;  %v491_v38 = vmax.f32 %v459_v36, 0.0 }
  0x42   : > { %v492_v39 = vmax.f32 %v460_v37, 0.0 }
  0x43   : > { %523 = vst [vmem:[%s862_s6 + $0xf0] sm:$0xff] %v491_v38 }
  0x44   : > { %524 = vst [vmem:[%s862_s6 + $0xf8] sm:$0xff] %v492_v39 }
  0x45 PF: > { %s14_s15 = sadd.s32 1, %s780_s15  }
  0x46   : > { %p11_p4 = scmp.ge.s32.totalorder %s14_s15, 4  }
  0x48   :  { %13 = sbr.rel (!%p11_p4) target bundleno = 1 (0x1), region = 69 }

</bundles_post_ra>
